<compile_context>
chip_gen: v7x
topology: tpu7x:2x2x1
jax: 0.10.0
libtpu: 0.0.40
codegen_flags: <defaults>
</compile_context>

<pallas_src>
import jax
import jax.numpy as jnp
from jax import lax
from jax.experimental import pallas as pl
from jax.experimental.pallas import tpu as pltpu


def se_block_kernel(x_ref, w1_ref, b1_ref, w2_ref, b2_ref, o_ref):
    # x_ref/o_ref: (Bt, C, HW) tiles in the input's native dtype.
    # w1_ref: (hidden, C) pre-scaled by 1/HW; b1_ref: (1, hidden)
    # w2_ref: (C, hidden);                    b2_ref: (1, C)       (all f32)

    # --- squeeze: spatial sum over the HW lane axis, accumulated in f32.
    # (The 1/HW of the mean is folded into W1 in the wrapper.)
    pooled = jnp.sum(x_ref[...], axis=-1, dtype=jnp.float32)          # (Bt, C)

    # --- excitation MLP: weights stay un-broadcast (stationary across the Bt
    # activations); contraction over C / hidden via dot_general.
    h = lax.dot_general(pooled, w1_ref[...],
                        dimension_numbers=(((1,), (1,)), ((), ())),
                        preferred_element_type=jnp.float32)           # (Bt, hidden)
    h = jnp.maximum(h + b1_ref[...], 0.0)

    s = lax.dot_general(h, w2_ref[...],
                        dimension_numbers=(((1,), (1,)), ((), ())),
                        preferred_element_type=jnp.float32)           # (Bt, C)
    s = jax.nn.sigmoid(s + b2_ref[...])

    # --- scale: re-read x from VMEM (don't keep the whole tile live in vregs
    # across the MLP); broadcast the per-(b, c) gate over the HW lane axis.
    gate = s.astype(o_ref.dtype)[:, :, None]                          # (Bt, C, 1)
    o_ref[...] = x_ref[...] * gate


def _vmem_capacity_bytes():
    """Per-TensorCore VMEM capacity; conservative v7x default if unqueryable."""
    try:
        return int(pltpu.get_tpu_info().vmem_capacity_bytes)
    except Exception:
        return 64 << 20


def _pick_block_b(B, per_img_bytes, resident_bytes, tile_budget, min_steps=2):
    """Largest divisor of B whose double-buffered in/out tiles fit `tile_budget`,
    preferring >= `min_steps` grid steps (keeps both v7x TensorCores fed)."""
    fits = [d for d in range(1, B + 1)
            if B % d == 0 and 4 * d * per_img_bytes + resident_bytes <= tile_budget]
    if not fits:
        # TODO(synk): needs the HW-tiled two-pass fallback for this shape.
        return 1
    multi = [d for d in fits if B // d >= min_steps]
    return max(multi) if multi else max(fits)


def _resident_spec(shape):
    """Constant-index (resident) operand; single-buffered when supported."""
    zeros = (0,) * len(shape)
    try:
        return pl.BlockSpec(shape, lambda i: zeros, pipeline_mode=pl.Buffered(1))
    except (TypeError, AttributeError):
        return pl.BlockSpec(shape, lambda i: zeros)


def se_block(x, w1, b1, w2, b2, *, block_b=None):
    """x: (B, C, H, W).  nn.Linear layouts: w1 (hidden, C), b1 (hidden,),
    w2 (C, hidden), b2 (C,)."""
    B, C, H, W = x.shape
    hidden = w1.shape[0]
    HW = H * W
    itemsize = jnp.dtype(x.dtype).itemsize

    per_img_bytes = C * HW * itemsize
    # Weights/biases (f32) are resident and single-buffered.
    resident_bytes = 4 * (hidden * C + hidden + C * hidden + C)

    # Generation-aware budgets: v7x has 64 MiB VMEM/TC, v5e/v6e have 128 MiB.
    vmem_cap = _vmem_capacity_bytes()
    if vmem_cap <= (64 << 20):           # v7x-class
        tile_budget, vmem_limit_cap = 28 << 20, 48 << 20
    else:                                # v5e / v6e
        tile_budget, vmem_limit_cap = 44 << 20, 96 << 20

    if block_b is None:
        block_b = _pick_block_b(B, per_img_bytes, resident_bytes, tile_budget)
    assert B % block_b == 0, "block_b must divide B"

    # Wrapper-side prep: flatten spatial dims, fold 1/HW into W1, shape biases
    # to broadcast directly against (Bt, dim) activations.
    x_flat = x.reshape(B, C, HW)
    w1_scaled = w1.astype(jnp.float32) / HW        # (hidden, C)
    b1_2d = b1.astype(jnp.float32).reshape(1, hidden)
    w2_f = w2.astype(jnp.float32)                  # (C, hidden)
    b2_2d = b2.astype(jnp.float32).reshape(1, C)

    tile_bytes = block_b * per_img_bytes
    vmem_need = 4 * tile_bytes + resident_bytes + (2 << 20)
    vmem_limit = int(min(max(vmem_need, 16 << 20), vmem_limit_cap))

    cost = pl.CostEstimate(
        flops=2 * B * C * HW + 4 * B * C * hidden,
        transcendentals=B * C,
        bytes_accessed=2 * B * C * HW * itemsize
        + 4 * (hidden * C + hidden + C * hidden + C),
    )

    grid = (B // block_b,)
    out_flat = pl.pallas_call(
        se_block_kernel,
        out_shape=jax.ShapeDtypeStruct((B, C, HW), x.dtype),
        grid_spec=pltpu.PrefetchScalarGridSpec(
            num_scalar_prefetch=0,
            grid=grid,
            in_specs=[
                pl.BlockSpec((block_b, C, HW), lambda i: (i, 0, 0)),   # x tile
                _resident_spec((hidden, C)),                           # W1/HW
                _resident_spec((1, hidden)),                           # b1
                _resident_spec((C, hidden)),                           # W2
                _resident_spec((1, C)),                                # b2
            ],
            out_specs=pl.BlockSpec((block_b, C, HW), lambda i: (i, 0, 0)),
        ),
        compiler_params=pltpu.CompilerParams(
            dimension_semantics=("parallel",),
            vmem_limit_bytes=vmem_limit,
        ),
        cost_estimate=cost,
    )(x_flat, w1_scaled, b1_2d, w2_f, b2_2d)

    return out_flat.reshape(B, C, H, W)


def init_params(key, channels, reduction=16):
    hidden = channels // reduction
    k1, k2, k3, k4 = jax.random.split(key, 4)
    # nn.Linear native layouts: weight (out_features, in_features).
    w1 = jax.random.normal(k1, (hidden, channels), jnp.float32) * 0.1
    b1 = jax.random.normal(k2, (hidden,), jnp.float32) * 0.1
    w2 = jax.random.normal(k3, (channels, hidden), jnp.float32) * 0.1
    b2 = jax.random.normal(k4, (channels,), jnp.float32) * 0.1
    return w1, b1, w2, b2


def se_block_ref(x, w1, b1, w2, b2):
    # Pure-JAX reference matching the PyTorch forward.
    pooled = jnp.mean(x, axis=(2, 3))                    # (B, C)
    h = jnp.maximum(pooled @ w1.T + b1, 0.0)
    s = jax.nn.sigmoid(h @ w2.T + b2)
    return x * s[:, :, None, None]


if __name__ == "__main__":
    key = jax.random.PRNGKey(0)
    kx, kp = jax.random.split(key)

    # channels=32, reduction=16 -> hidden=2; B=8 so the batched grid has >1 step.
    B, C, H, W = 8, 32, 16, 16
    x = jax.random.normal(kx, (B, C, H, W), jnp.float32)
    w1, b1, w2, b2 = init_params(kp, C, reduction=16)

    out = jax.block_until_ready(se_block(x, w1, b1, w2, b2))
    ref = se_block_ref(x, w1, b1, w2, b2)
    assert out.shape == (B, C, H, W)
    assert jnp.allclose(out, ref, atol=1e-5, rtol=1e-5), "mismatch vs reference"

    print("KERNEL_OK")
</pallas_src>

<mosaic_0001>
module attributes {stable_mosaic.version = 11 : i64} {
  func.func @se_block_kernel(%arg0: i32, %arg1: memref<4x32x256xf32, #tpu.memory_space<vmem>>, %arg2: memref<2x32xf32, #tpu.memory_space<vmem>>, %arg3: memref<1x2xf32, #tpu.memory_space<vmem>>, %arg4: memref<32x2xf32, #tpu.memory_space<vmem>>, %arg5: memref<1x32xf32, #tpu.memory_space<vmem>>, %arg6: memref<4x32x256xf32, #tpu.memory_space<vmem>>) attributes {dimension_semantics = [#tpu.dimension_semantics<parallel>], iteration_bounds = array<i64: 2>, scalar_prefetch = 0 : i64, scratch_operands = 0 : i64, tpu.core_type = #tpu.core_type<tc>, window_params = [{transform_indices = @transform_0, window_bounds = array<i64: 4, 32, 256>}, {pipeline_mode = #tpu.pipeline_mode<synchronous>, transform_indices = @transform_1, window_bounds = array<i64: 2, 32>}, {pipeline_mode = #tpu.pipeline_mode<synchronous>, transform_indices = @transform_2, window_bounds = array<i64: 1, 2>}, {pipeline_mode = #tpu.pipeline_mode<synchronous>, transform_indices = @transform_3, window_bounds = array<i64: 32, 2>}, {pipeline_mode = #tpu.pipeline_mode<synchronous>, transform_indices = @transform_4, window_bounds = array<i64: 1, 32>}, {transform_indices = @transform_5, window_bounds = array<i64: 4, 32, 256>}]} {
    %c0 = arith.constant 0 : index
    %c0_0 = arith.constant 0 : index
    %c0_1 = arith.constant 0 : index
    %0 = vector.load %arg1[%c0, %c0_0, %c0_1] : memref<4x32x256xf32, #tpu.memory_space<vmem>>, vector<4x32x256xf32>
    %cst = arith.constant dense<0.000000e+00> : vector<4x32xf32>
    %1 = vector.multi_reduction <add>, %0, %cst [2] : vector<4x32x256xf32> to vector<4x32xf32>
    %c0_2 = arith.constant 0 : index
    %c0_3 = arith.constant 0 : index
    %2 = vector.load %arg2[%c0_2, %c0_3] : memref<2x32xf32, #tpu.memory_space<vmem>>, vector<2x32xf32>
    %cst_4 = arith.constant dense<0.000000e+00> : vector<4x2xf32>
    %3 = tpu.matmul %1, %2, %cst_4 {dimension_numbers = #tpu.dot_dimension_numbers<[1], [1], [0], [0], [0, 0, 1, 0], [], []>} : vector<4x32xf32>, vector<2x32xf32>, vector<4x2xf32> -> vector<4x2xf32>
    %c0_5 = arith.constant 0 : index
    %c0_6 = arith.constant 0 : index
    %4 = vector.load %arg3[%c0_5, %c0_6] : memref<1x2xf32, #tpu.memory_space<vmem>>, vector<1x2xf32>
    %5 = vector.broadcast %4 : vector<1x2xf32> to vector<4x2xf32>
    %6 = arith.addf %3, %5 : vector<4x2xf32>
    %cst_7 = arith.constant 0.000000e+00 : f32
    %7 = vector.broadcast %cst_7 : f32 to vector<4x2xf32>
    %8 = arith.maximumf %6, %7 : vector<4x2xf32>
    %c0_8 = arith.constant 0 : index
    %c0_9 = arith.constant 0 : index
    %9 = vector.load %arg4[%c0_8, %c0_9] : memref<32x2xf32, #tpu.memory_space<vmem>>, vector<32x2xf32>
    %cst_10 = arith.constant dense<0.000000e+00> : vector<4x32xf32>
    %10 = tpu.matmul %8, %9, %cst_10 {dimension_numbers = #tpu.dot_dimension_numbers<[1], [1], [0], [0], [0, 0, 1, 0], [], []>} : vector<4x2xf32>, vector<32x2xf32>, vector<4x32xf32> -> vector<4x32xf32>
    %c0_11 = arith.constant 0 : index
    %c0_12 = arith.constant 0 : index
    %11 = vector.load %arg5[%c0_11, %c0_12] : memref<1x32xf32, #tpu.memory_space<vmem>>, vector<1x32xf32>
    %12 = vector.broadcast %11 : vector<1x32xf32> to vector<4x32xf32>
    %13 = arith.addf %10, %12 : vector<4x32xf32>
    %14 = arith.negf %13 : vector<4x32xf32>
    %15 = math.exp %14 : vector<4x32xf32>
    %cst_13 = arith.constant 1.000000e+00 : f32
    %16 = vector.broadcast %cst_13 : f32 to vector<4x32xf32>
    %17 = arith.addf %16, %15 : vector<4x32xf32>
    %18 = arith.divf %16, %17 : vector<4x32xf32>
    %19 = vector.shape_cast %18 : vector<4x32xf32> to vector<4x32x1xf32>
    %c0_14 = arith.constant 0 : index
    %c0_15 = arith.constant 0 : index
    %c0_16 = arith.constant 0 : index
    %20 = vector.load %arg1[%c0_14, %c0_15, %c0_16] : memref<4x32x256xf32, #tpu.memory_space<vmem>>, vector<4x32x256xf32>
    %21 = vector.broadcast %19 : vector<4x32x1xf32> to vector<4x32x256xf32>
    %22 = arith.mulf %20, %21 : vector<4x32x256xf32>
    %c0_17 = arith.constant 0 : index
    %c0_18 = arith.constant 0 : index
    %c0_19 = arith.constant 0 : index
    %23 = vector.load %arg6[%c0_17, %c0_18, %c0_19] : memref<4x32x256xf32, #tpu.memory_space<vmem>>, vector<4x32x256xf32>
    tpu.vector_store %arg6[%c0_17, %c0_18, %c0_19], %22 {strides = array<i32>} : memref<4x32x256xf32, #tpu.memory_space<vmem>>, vector<4x32x256xf32>,
    return
  }
  func.func @transform_0(%arg0: i32) -> (i32, i32, i32) {
    %c0_i32 = arith.constant 0 : i32
    %c0_i32_0 = arith.constant 0 : i32
    %c0_i32_1 = arith.constant 0 : i32
    return %arg0, %c0_i32, %c0_i32_0 : i32, i32, i32
  }
  func.func @transform_1(%arg0: i32) -> (i32, i32) {
    %c0_i32 = arith.constant 0 : i32
    %c0_i32_0 = arith.constant 0 : i32
    %c0_i32_1 = arith.constant 0 : i32
    return %c0_i32, %c0_i32_0 : i32, i32
  }
  func.func @transform_2(%arg0: i32) -> (i32, i32) {
    %c0_i32 = arith.constant 0 : i32
    %c0_i32_0 = arith.constant 0 : i32
    %c0_i32_1 = arith.constant 0 : i32
    return %c0_i32, %c0_i32_0 : i32, i32
  }
  func.func @transform_3(%arg0: i32) -> (i32, i32) {
    %c0_i32 = arith.constant 0 : i32
    %c0_i32_0 = arith.constant 0 : i32
    %c0_i32_1 = arith.constant 0 : i32
    return %c0_i32, %c0_i32_0 : i32, i32
  }
  func.func @transform_4(%arg0: i32) -> (i32, i32) {
    %c0_i32 = arith.constant 0 : i32
    %c0_i32_0 = arith.constant 0 : i32
    %c0_i32_1 = arith.constant 0 : i32
    return %c0_i32, %c0_i32_0 : i32, i32
  }
  func.func @transform_5(%arg0: i32) -> (i32, i32, i32) {
    %c0_i32 = arith.constant 0 : i32
    %c0_i32_0 = arith.constant 0 : i32
    %c0_i32_1 = arith.constant 0 : i32
    return %arg0, %c0_i32, %c0_i32_0 : i32, i32, i32
  }
}

</mosaic_0001>

<bundles_post_ra>
// kernel: tpu_custom_call.1
= control target key start
LH: loop header
LB: loop body
LE: loop exit
PB: predicated region body
PF: predicated region fallthrough
CT: control target
= control target key end

     0   :  { %10 = vsyncpa [#allocation3], 0  ;;  %s1514_s0 = inlined_call_operand.hbm [shape: f32[8,32,256], index: 0, kind: input, shape index: {}]   ;;  %s1515_s1 = inlined_call_operand.vmem [shape: f32[2,32], index: 1, kind: input, shape index: {}]   ;;  %s1516_s2 = inlined_call_operand.vmem [shape: f32[1,2], index: 2, kind: input, shape index: {}]   ;;  %s1517_s3 = inlined_call_operand.vmem [shape: f32[32,2], index: 3, kind: input, shape index: {}]   ;;  %s1518_s4 = inlined_call_operand.vmem [shape: f32[1,32], index: 4, kind: input, shape index: {}]   ;;  %s1519_s5 = inlined_call_operand.hbm [shape: f32[8,32,256], index: 5, kind: output, shape index: {}]  }
   0x1   :  { %12 = vsyncpa [#allocation3 + $0x1], 0 }
   0x2   :  { %13 = vsyncpa [#allocation4], 0 }
   0x3   :  { %15 = vsyncpa [#allocation4 + $0x1], 0  ;;  %s1103_s18 = smov 0   ;;  %s1105_s19 = smov 0  }
   0x4   :  { %s1107_s20 = smov 0   ;;  %s1109_s21 = smov 0  }
   0x5 LB: > { %s1124_s22 = sadd.s32 4294967295, %s1062_s21   ;;  %s848_s23 = sadd.s32 4294967294, %s1062_s21   ;;  %s1062_s21 = sphi %s1109_s21, %s1535_s21   ;;  %s1058_s20 = sphi %s1107_s20, %s1534_s20   ;;  %s1054_s19 = sphi %s1105_s19, %s1533_s19   ;;  %s1050_s18 = sphi %s1103_s18, %s1532_s18  }
   0x6   : > { %s1128_s24 = sadd.s32 1, %s1062_s21   ;;  %s28_s25 = sadd.s32 1, %s1058_s20 }
   0x7   : > { %s25_s26 = ssub.s32 %s1062_s21, %s1128_s24  ;;  %p35_p0 = scmp.ne.s32.totalorder %s1058_s20, %s1054_s19 }
   0x8   : > { %p26_p1 = scmp.eq.s32.totalorder %s25_s26, 0  ;;  %p36_p2 = scmp.eq.s32.totalorder %s1062_s21, 0 }
   0x9   : > { %p41_p3 = scmp.ne.s32.totalorder %s1054_s19, %s1050_s18  ;;  %p42_p4 = scmp.eq.s32.totalorder %s1124_s22, 0 }
   0xa   : > { %s1140_s27 = scalar_select %p26_p1, %s1058_s20, %s28_s25  }
   0xb   : > { %p1142_p5 = por %p36_p2, %p35_p0  ;;  %p1146_p6 = por %p42_p4, %p41_p3 }
   0xc   : > { %p149_p7 = scmp.eq.s32.totalorder %s1124_s22, 1  ;;  %p155_p8 = scmp.eq.s32.totalorder %s848_s23, 1 }
   0xd   : > { %p921_p10 = scmp.lt.s32.totalorder %s1062_s21, 2  ;;  %s187_s7 = sand.u32 1, %s1058_s20  }
   0xe   : > { %p1153_p11 = por %p149_p7, %p35_p0  ;;  %p1157_p12 = por %p155_p8, %p41_p3 }
   0xf   : > { %s875_s8 = sshll.u32 %s1062_s21, 12  ;;  %s851_s9 = sshll.u32 %s187_s7, 8 }
  0x10   : > { %s1524_s30 = scalar_select %p1153_p11, 1, 0 }
  0x11   : > { %s1525_s6 = scalar_select %p1157_p12, 1, 0 }
  0x12   : > { %s1166_s12 = scalar_lea.hbm %s1514_s0, %s875_s8  ;;  %s191_s13 = scalar_lea.vmem [#allocation2], %s851_s9 }
  0x13   : > { %s199_s14 = sshll.u32 %s191_s13, 4  ;;  %p1170_p13 = pnand %p921_p10, %p1142_p5  ;;  %s1174_s14 = int_to_ptr.vmem [resolvable:$true] %s199_s14 }
  0x14   : > { %s1176_s16 = scalar_lea.sflag [#allocation3], %s187_s7  ;;  %s966_s17 = scalar_lea.hbm %s1166_s12, 4096 }
  0x15   : > { %p967_p0 = scmp.ne.s32.totalorder %s1166_s12, %s966_s17  ;;  %p968_p1 = pneg %p1170_p13 }
  0x16   : > { %s971_s26 = scalar_lea.hbm %s1514_s0, 8192  ;;  %p972_p4 = scmp.lt.u32.totalorder %s1166_s12, %s1514_s0 }
  0x17   : > { %p969_p2 = pnand %p968_p1, %p967_p0  ;;  %p973_p5 = scmp.lt.u32.totalorder %s971_s26, %s966_s17 }
  0x18   : > { %p975_p8 = scmp.lt.u32.totalorder %s966_s17, %s1166_s12 }
  0x19   : > { %p970_p3 = pneg %p969_p2  ;;  %p974_p7 = por %p973_p5, %p972_p4 }
  0x1b   : > { %p976_p10 = por %p975_p8, %p974_p7 }
  0x1d   : > { %p977_p9 = pnand %p976_p10, %p970_p3 }
  0x1f   : > { %980 = shalt.err (!%p977_p9)
}
  0x20   : > { %s981_s7 = scalar_lea.vmem %s1174_s14, 4096  ;;  %s1064_s9 = smov [#allocation2]  }
  0x21   : > { %p982_p0 = scmp.ne.s32.totalorder %s1174_s14, %s981_s7  ;;  %s986_s10 = sshll.u32 %s1064_s9, 4  ;;  %s987_s10 = int_to_ptr.vmem [resolvable:$false] %s986_s10 }
  0x22   : > { %s988_s11 = scalar_lea.vmem %s987_s10, 8192  ;;  %p989_p11 = scmp.lt.s32.totalorder %s1174_s14, %s987_s10 }
  0x23   : > { %p984_p2 = pnand %p982_p0, %p968_p1  ;;  %p990_p4 = scmp.lt.s32.totalorder %s988_s11, %s981_s7 }
  0x25   : > { %p985_p12 = pneg %p984_p2  ;;  %p991_p5 = por %p990_p4, %p989_p11 }
  0x27   : > { %p992_p7 = pnand %p991_p5, %p985_p12 }
  0x29   : > { %995 = shalt.err (!%p992_p7)
}
  0x2a   : > { %s1065_s13 = smov 256   ;;  %s1066_s17 = smov 16  }
  0x2b   : > { %916 = dma.hbm_to_vmem [thread:$0]  (!%p1170_p13), %s1166_s12, 4096, %s1174_s14, %s1176_s16, %s1065_s13, %s1065_s13, %s1066_s17  }
  0x2c   : > { %p855_p9 = scmp.ge.s32.totalorder %s1062_s21, 1  ;;  %p207_p1 = scmp.lt.s32.totalorder %s1062_s21, 3 }
  0x2e   : > { %p208_p3 = pnand %p855_p9, %p207_p1 }
  0x30   : > { %211 = sbr.rel (%p208_p3) target bundleno = 860 (0x35c), region = 40 }
  0x37   : > { %s1207_s23 = sand.u32 1, %s1054_s19  }
  0x38   : > { %s856_s25 = sshll.u32 %s1207_s23, 8  ;;  %s214_s26 = scalar_lea.sflag [#allocation3], %s1207_s23 }
  0x39   : > { %s1213_s28 = scalar_lea.vmem [#allocation2], %s856_s25 }
  0x3a   : > { %1041 = dma.done.wait (%p1146_p6), %s214_s26, 4096  }
  0x3b   : > { %1043 = vsyncadd (%p1146_p6), %s214_s26, 4294963200  ;;  %v1220_v0 = vld [vmem:[%s1213_s28 + $0x40] sm:$0xff]  ;;  %v1223_v1 = vld [vmem:[%s1213_s28 + $0x48] sm:$0xff]  ;;  %v1067_v48 = vmov 0.0   ;;  %vm440_vm0 = vcmask 261120   ;;  %vm1068_vm1 = vmmov 0   ;;  %v350_v61 = vlaneseq }
  0x3c   : > { %v1226_v2 = vld [vmem:[%s1213_s28] sm:$0xff]  ;;  %v290_v3 = vadd.f32 %v1223_v1, %v1220_v0  ;;  %v1231_v4 = vld [vmem:[%s1213_s28 + $0x8] sm:$0xff]  ;;  %v1234_v5 = vld [vmem:[%s1213_s28 + $0x50] sm:$0xff]  ;;  %885 = vmatprep.subr.mxu0 %v1067_v48  ;;  %887 = vmatprep.mubr.msk.f32.mxu0 %vm1068_vm1, %v1067_v48  ;;  %vm528_vm2 = vcmask 15360   ;;  %v1069_v52 = vmov 0.0|0.0   ;;  %vm361_vm4 = vcmask 130112  }
  0x3d   : > { %v1237_v6 = vld [vmem:[%s1213_s28 + $0x58] sm:$0xff]  ;;  %v278_v7 = vadd.f32 %v1231_v4, %v1226_v2  ;;  %v1242_v8 = vld [vmem:[%s1213_s28 + $0x10] sm:$0xff]  ;;  %v1252_v12 = vld [vmem:[%s1213_s28 + $0x60] sm:$0xff]  ;;  %898 = vmatprep.mubr.msk.f32.mxu1 %vm1068_vm1, %v1067_v48  ;;  %901 = vmatprep.subr.bf16.mxu1 %v1069_v52  ;;  %vm368_vm5 = vcmask 195712   ;;  %vm375_vm6 = vcmask 261312   ;;  %vm434_vm7 = vcmask 1041409  }
  0x3e   : > { %v1245_v9 = vld [vmem:[%s1213_s28 + $0x18] sm:$0xff]  ;;  %291 = vadd.xlane.f32.xlu1 %v290_v3  ;;  %v293_v10 = vadd.f32 %v1237_v6, %v1234_v5  ;;  %v1255_v13 = vld [vmem:[%s1213_s28 + $0x68] sm:$0xff]  ;;  %v1258_v14 = vld [vmem:[%s1213_s28 + $0x20] sm:$0xff]  ;;  %v351_v3 = vand.u32 127, %v350_v61  ;;  %vm436_vm8 = vcmask 1042434   ;;  %vm438_vm9 = vcmask 1043459  }
  0x3f   : > { %279 = vadd.xlane.f32.xlu0 %v278_v7  ;;  %v281_v11 = vadd.f32 %v1245_v9, %v1242_v8  ;;  %v1261_v15 = vld [vmem:[%s1213_s28 + $0x28] sm:$0xff]  ;;  %v296_v16 = vadd.f32 %v1255_v13, %v1252_v12  ;;  %v1268_v18 = vld [vmem:[%s1213_s28 + $0x90] sm:$0xff]  ;;  %v1271_v19 = vld [vmem:[%s1213_s28 + $0x98] sm:$0xff]  ;;  %s1401_s29 = scalar_lea.vmem [#allocation5], %s856_s25  ;;  %s877_s25 = sshll.u32 %s1124_s22, 12 }
  0x40   : > { %v284_v17 = vadd.f32 %v1261_v15, %v1258_v14  ;;  %v1274_v20 = vld [vmem:[%s1213_s28 + $0x80] sm:$0xff]  ;;  %v1277_v21 = vld [vmem:[%s1213_s28 + $0x88] sm:$0xff]  ;;  %v305_v22 = vadd.f32 %v1271_v19, %v1268_v18  ;;  %v1284_v24 = vld [vmem:[%s1213_s28 + $0x70] sm:$0xff]  ;;  %s775_s12 = sshll.u32 %s1401_s29, 4  ;;  %s1464_s16 = scalar_lea.hbm %s1519_s5, %s877_s25  ;;  %s1466_s12 = int_to_ptr.vmem [resolvable:$true] %s775_s12 }
  0x41   : > { %v302_v23 = vadd.f32 %v1277_v21, %v1274_v20  ;;  %v1287_v25 = vld [vmem:[%s1213_s28 + $0x78] sm:$0xff]  ;;  %v1290_v26 = vld [vmem:[%s1213_s28 + $0x30] sm:$0xff]  ;;  %v1300_v30 = vld [vmem:[%s1213_s28 + $0xc0] sm:$0xff]  ;;  %s761_s22 = scalar_lea.sflag [#allocation4], %s1207_s23  ;;  %s996_s8 = scalar_lea.vmem %s1466_s12, 4096 }
  0x42   : > { %294 = vadd.xlane.f32.xlu1 %v293_v10  ;;  %v1293_v27 = vld [vmem:[%s1213_s28 + $0x38] sm:$0xff]  ;;  %v299_v28 = vadd.f32 %v1287_v25, %v1284_v24  ;;  %v1303_v31 = vld [vmem:[%s1213_s28 + $0xc8] sm:$0xff]  ;;  %v1306_v32 = vld [vmem:[%s1213_s28 + $0xa0] sm:$0xff]  ;;  %p997_p6 = scmp.ne.s32.totalorder %s1466_s12, %s996_s8  ;;  %p1529_p11 = scmp.ne.s32.totalorder %s1524_s30, 0 }
  0x43   : > { %282 = vadd.xlane.f32.xlu0 %v281_v11  ;;  %v287_v29 = vadd.f32 %v1293_v27, %v1290_v26  ;;  %v1309_v33 = vld [vmem:[%s1213_s28 + $0xa8] sm:$0xff]  ;;  %v314_v34 = vadd.f32 %v1303_v31, %v1300_v30  ;;  %v1316_v36 = vld [vmem:[%s1213_s28 + $0xb0] sm:$0xff]  ;;  %v1319_v37 = vld [vmem:[%s1213_s28 + $0xb8] sm:$0xff]  ;;  %v356_v11 = vadd.s32 4294967288, %v351_v3  ;;  %s1070_s7 = smov [#allocation5]  }
  0x44   : > { %v308_v35 = vadd.f32 %v1309_v33, %v1306_v32  ;;  %v1322_v38 = vld [vmem:[%s1213_s28 + $0xd0] sm:$0xff]  ;;  %v1325_v39 = vld [vmem:[%s1213_s28 + $0xd8] sm:$0xff]  ;;  %v311_v40 = vadd.f32 %v1319_v37, %v1316_v36  ;;  %v1338_v44 = vld [vmem:[%s1213_s28 + $0xe0] sm:$0xff]  ;;  %p998_p12 = pnand %p997_p6, %p1529_p11  ;;  %s1000_s9 = sshll.u32 %s1070_s7, 4  ;;  %s1001_s9 = int_to_ptr.vmem [resolvable:$false] %s1000_s9 }
  0x45   : > { %v317_v41 = vadd.f32 %v1325_v39, %v1322_v38  ;;  %v1332_v42 = vld [vmem:[%s1213_s28 + $0xf0] sm:$0xff]  ;;  %v1335_v43 = vld [vmem:[%s1213_s28 + $0xf8] sm:$0xff]  ;;  %v1341_v45 = vld [vmem:[%s1213_s28 + $0xe8] sm:$0xff]  ;;  %s1002_s10 = scalar_lea.vmem %s1001_s9, 8192  ;;  %p1003_p8 = scmp.lt.s32.totalorder %s1466_s12, %s1001_s9 }
  0x46   : > { %297 = vadd.xlane.f32.xlu1 %v296_v16  ;;  %1527 = vst [vmem:[#allocation8_spill] sm:$0xff] %v1335_v43  ;;  %v323_v46 = vadd.f32 %v1335_v43, %v1332_v42  ;;  %v320_v47 = vadd.f32 %v1341_v45, %v1338_v44  ;;  %v326_v49 = vld [vmem:[%s1515_s1] sm:$0x3]  ;;  %v518_v51 = vld [vmem:[%s1517_s3 + $0x8] sm:$0xff]  ;;  %vm903_vm3 = vmpackc.low %vm528_vm2, %vm528_vm2  ;;  %v1365_v16 = vshrl.u32 %v350_v61, 7  ;;  %p999_p13 = pneg %p998_p12  ;;  %p1004_p10 = scmp.lt.s32.totalorder %s1002_s10, %s996_s8 }
  0x47   : > { %285 = vadd.xlane.f32.xlu0 %v284_v17  ;;  %886 = vmatpush3.xpose.msk.msra.mxu0 %vm440_vm0, %v326_v49  ;;  %v517_v50 = vld [vmem:[%s1517_s3] sm:$0xff]  ;;  %v519_v54 = vld [vmem:[%s1517_s3 + $0x10] sm:$0xff]  ;;  %v520_v55 = vld [vmem:[%s1517_s3 + $0x18] sm:$0xff]  ;;  %v363_v17 = vadd.s32 4294967280, %v351_v3 }
  0x48   : > { %v902_v53 = vpack.c.bf16 %v518_v51, %v517_v50  ;;  %v906_v56 = vpack.c.bf16 %v520_v55, %v519_v54  ;;  %p1005_p0 = por %p1004_p10, %p1003_p8 }
  0x4a   : > { %306 = vadd.xlane.f32.xlu1 %v305_v22  ;;  %904 = vmatpush3.bf16.xpose.msk.msra.mxu1 %vm903_vm3, %v902_v53  ;;  %v370_v22 = vadd.s32 4294967272, %v351_v3  ;;  %p1006_p2 = pnand %p1005_p0, %p999_p13 }
  0x4b   : > { %303 = vadd.xlane.f32.xlu0 %v302_v23  ;;  %905 = vmatprep.subr.bf16.mxu1 %v1069_v52 }
  0x4e   : > { %300 = vadd.xlane.f32.xlu1 %v299_v28 }
  0x4f   : > { %288 = vadd.xlane.f32.xlu0 %v287_v29  ;;  %v359_v29 = vsub.s32 %v356_v11, %v1365_v16 }
  0x52   : > { %315 = vadd.xlane.f32.xlu1 %v314_v34  ;;  %908 = vmatpush3.bf16.xpose.msk.msra.mxu1 %vm903_vm3, %v906_v56  ;;  %v354_v34 = vsub.s32 %v351_v3, %v1365_v16 }
  0x53   : > { %309 = vadd.xlane.f32.xlu0 %v308_v35  ;;  %v366_v35 = vsub.s32 %v363_v17, %v1365_v16 }
  0x56   : > { %312 = vadd.xlane.f32.xlu1 %v311_v40  ;;  %v373_v40 = vsub.s32 %v370_v22, %v1365_v16 }
  0x57   : > { %318 = vadd.xlane.f32.xlu0 %v317_v41 }
  0x5a   : > { %324 = vadd.xlane.f32.xlu1 %v323_v46 }
  0x5b   : > { %321 = vadd.xlane.f32.xlu0 %v320_v47 }
  0xcb   : > { %v292_v57 = vpop.xlane.xlu1 %291 }
  0xcc   : > { %v280_v58 = vpop.xlane.xlu0 %279  ;;  %v380_v48 = vrot.slane %v292_v57, %v354_v34 }
  0xcd   : > { %v355_v56 = vrot.slane %v280_v58, %v354_v34 }
  0xcf   : > { %v295_v59 = vpop.xlane.xlu1 %294 }
  0xd0   : > { %v283_v60 = vpop.xlane.xlu0 %282  ;;  %v384_v47 = vrot.slane %v295_v59, %v359_v29 }
  0xd1   : > { %v360_v49 = vrot.slane %v283_v60, %v359_v29 }
  0xd2   : > { %v385_v17 = vsel %vm361_vm4, %v384_v47, %v380_v48 }
  0xd3   : > { %v298_v62 = vpop.xlane.xlu1 %297  ;;  %v362_v43 = vsel %vm361_vm4, %v360_v49, %v355_v56 }
  0xd4   : > { %v286_v63 = vpop.xlane.xlu0 %285  ;;  %v389_v50 = vrot.slane %v298_v62, %v366_v35 }
  0xd5   : > { %v367_v51 = vrot.slane %v286_v63, %v366_v35 }
  0xd6   : > { %v390_v57 = vsel %vm368_vm5, %v389_v50, %v385_v17 }
  0xd7   : > { %v307_v7 = vpop.xlane.xlu1 %306  ;;  %v369_v60 = vsel %vm368_vm5, %v367_v51, %v362_v43 }
  0xd8   : > { %v304_v10 = vpop.xlane.xlu0 %303  ;;  %v403_v52 = vrot.slane %v307_v7, %v359_v29 }
  0xd9   : > { %v399_v53 = vrot.slane %v304_v10, %v354_v34 }
  0xdb   : > { %v301_v23 = vpop.xlane.xlu1 %300  ;;  %v404_v62 = vsel %vm361_vm4, %v403_v52, %v399_v53 }
  0xdc   : > { %v289_v28 = vpop.xlane.xlu0 %288  ;;  %v394_v54 = vrot.slane %v301_v23, %v373_v40 }
  0xdd   : > { %v374_v61 = vrot.slane %v289_v28, %v373_v40 }
  0xde   : > { %v395_v63 = vsel %vm375_vm6, %v394_v54, %v390_v57  ;;  %v861_v54 = vld [vmem:[%s1518_s4] ss:$0 sm:$0xff] }
  0xdf   : > { %v316_v41 = vpop.xlane.xlu1 %315  ;;  %v376_v7 = vsel %vm375_vm6, %v374_v61, %v369_v60  ;;  %v641_v60 = vsub.s32 1, %v1365_v16 }
  0xe0   : > { %v310_v46 = vpop.xlane.xlu0 %309  ;;  %v418_v10 = vrot.slane %v316_v41, %v354_v34  ;;  %v435_v43 = vsel %vm434_vm7, %v395_v63, %v376_v7  ;;  %v858_v34 = vld [vmem:[%s1516_s2] ss:$0 sm:$0xff]  ;;  %v660_v63 = vsub.s32 2, %v1365_v16  ;;  %v679_v7 = vsub.s32 3, %v1365_v16 }
  0xe1   : > { %v408_v3 = vrot.slane %v310_v46, %v366_v35 }
  0xe3   : > { %v313_v55 = vpop.xlane.xlu1 %312  ;;  %v409_v23 = vsel %vm368_vm5, %v408_v3, %v404_v62 }
  0xe4   : > { %v319_v11 = vpop.xlane.xlu0 %318  ;;  %v413_v22 = vrot.slane %v313_v55, %v373_v40 }
  0xe5   : > { %v422_v59 = vrot.slane %v319_v11, %v359_v29 }
  0xe6   : > { %v414_v47 = vsel %vm375_vm6, %v413_v22, %v409_v23  ;;  %v622_v22 = vsub.s32 0, %v1365_v16 }
  0xe7   : > { %v325_v58 = vpop.xlane.xlu1 %324  ;;  %v423_v29 = vsel %vm361_vm4, %v422_v59, %v418_v10  ;;  %v437_v51 = vsel %vm436_vm8, %v414_v47, %v435_v43 }
  0xe8   : > { %v322_v28 = vpop.xlane.xlu0 %321  ;;  %v432_v46 = vrot.slane %v325_v58, %v373_v40 }
  0xe9   : > { %v427_v48 = vrot.slane %v322_v28, %v366_v35 }
  0xeb   : > { %v428_v49 = vsel %vm368_vm5, %v427_v48, %v423_v29 }
  0xec   : > { %v433_v50 = vsel %vm375_vm6, %v432_v46, %v428_v49 }
  0xed   : > { %v439_v52 = vsel %vm438_vm9, %v433_v50, %v437_v51 }
  0xee   : > { %888 = vmatmul.mubr.msk.f32.vlgmr.msra.gmra.mrb[0].mxu0 %vm440_vm0, %v439_v52 }
 0x1c1   : > { %v512_v40 = vpop.f32.mrb[0].mxu0 }
 0x1c2   : > { %v513_v41 = vadd.f32 %v858_v34, %v512_v40  ;;  %v889_v35 = vpop.f32.mrb[1].mxu0 }
 0x1c4   : > { %v516_v53 = vmax.f32 %v513_v41, 0.0 }
 0x1c6   : > { %899 = vmatmul.mubr.msk.f32.vlgmr.msra.gmra.mrb[0].mxu1 %vm528_vm2, %v516_v53 }
 0x299   : > { %v610_v55 = vpop.f32.mrb[0].mxu1 }
 0x29a   : > { %v611_v56 = vadd.f32 %v861_v54, %v610_v55  ;;  %v900_v61 = vpop.f32.mrb[1].mxu1 }
 0x29c   : > { %v867_v3 = vmul.f32 -1.442695, %v611_v56 }
 0x29e   : > { %962 = vpow2.f32 %v867_v3 }
 0x2a8   : > { %v963_v11 = vpop.eup %962 }
 0x2a9   : > { %v617_v17 = vadd.f32 1.0, %v963_v11 }
 0x2ab   : > { %964 = vrcp.f32 %v617_v17 }
 0x2b5   : > { %v965_v57 = vpop.eup %964 }
 0x2b6   : > { %v623_v59 = vrot.slane %v965_v57, %v622_v22  ;;  %v642_v62 = vrot.slane %v965_v57, %v641_v60  ;;  %v661_v58 = vrot.slane %v965_v57, %v660_v63  ;;  %v680_v10 = vrot.slane %v965_v57, %v679_v7 }
 0x2b8   : > { %629 = vbcast.lane.b32.xlu1 %v623_v59, 264  ;;  %625 = vbcast.lane.b32.xlu0 %v623_v59, 256 }
 0x2bc   : > { %633 = vbcast.lane.b32.xlu1 %v623_v59, 272  ;;  %644 = vbcast.lane.b32.xlu0 %v642_v62, 256 }
 0x2c0   : > { %637 = vbcast.lane.b32.xlu1 %v623_v59, 280  ;;  %652 = vbcast.lane.b32.xlu0 %v642_v62, 272 }
 0x2c4   : > { %648 = vbcast.lane.b32.xlu1 %v642_v62, 264  ;;  %663 = vbcast.lane.b32.xlu0 %v661_v58, 256 }
 0x2c8   : > { %656 = vbcast.lane.b32.xlu1 %v642_v62, 280  ;;  %671 = vbcast.lane.b32.xlu0 %v661_v58, 272 }
 0x2cc   : > { %667 = vbcast.lane.b32.xlu1 %v661_v58, 264  ;;  %682 = vbcast.lane.b32.xlu0 %v680_v10, 256 }
 0x2d0   : > { %675 = vbcast.lane.b32.xlu1 %v661_v58, 280  ;;  %690 = vbcast.lane.b32.xlu0 %v680_v10, 272 }
 0x2d4   : > { %686 = vbcast.lane.b32.xlu1 %v680_v10, 264 }
 0x2d8   : > { %694 = vbcast.lane.b32.xlu1 %v680_v10, 280 }
 0x32a   : > { %v630_v23 = vpop.permute.xlu1 %629  ;;  %v626_v28 = vpop.permute.xlu0 %625 }
 0x32b   : > { %v698_v46 = vmul.f32 %v630_v23, %v1242_v8  ;;  %v699_v47 = vmul.f32 %v630_v23, %v1245_v9  ;;  %v696_v48 = vmul.f32 %v626_v28, %v1226_v2  ;;  %v697_v16 = vmul.f32 %v626_v28, %v1231_v4 }
 0x32d   : > { %730 = vst [vmem:[%s1401_s29 + $0x10] sm:$0xff] %v698_v46  ;;  %731 = vst [vmem:[%s1401_s29 + $0x18] sm:$0xff] %v699_v47 }
 0x32e   : > { %728 = vst [vmem:[%s1401_s29] sm:$0xff] %v696_v48  ;;  %729 = vst [vmem:[%s1401_s29 + $0x8] sm:$0xff] %v697_v16  ;;  %v634_v8 = vpop.permute.xlu1 %633  ;;  %v645_v2 = vpop.permute.xlu0 %644 }
 0x32f   : > { %v700_v4 = vmul.f32 %v634_v8, %v1258_v14  ;;  %v701_v9 = vmul.f32 %v634_v8, %v1261_v15  ;;  %v704_v29 = vmul.f32 %v645_v2, %v1220_v0  ;;  %v705_v43 = vmul.f32 %v645_v2, %v1223_v1 }
 0x331   : > { %732 = vst [vmem:[%s1401_s29 + $0x20] sm:$0xff] %v700_v4  ;;  %733 = vst [vmem:[%s1401_s29 + $0x28] sm:$0xff] %v701_v9 }
 0x332   : > { %736 = vst [vmem:[%s1401_s29 + $0x40] sm:$0xff] %v704_v29  ;;  %737 = vst [vmem:[%s1401_s29 + $0x48] sm:$0xff] %v705_v43  ;;  %v638_v49 = vpop.permute.xlu1 %637  ;;  %v653_v50 = vpop.permute.xlu0 %652 }
 0x333   : > { %v702_v51 = vmul.f32 %v638_v49, %v1290_v26  ;;  %v703_v14 = vmul.f32 %v638_v49, %v1293_v27  ;;  %v708_v15 = vmul.f32 %v653_v50, %v1252_v12  ;;  %v709_v0 = vmul.f32 %v653_v50, %v1255_v13 }
 0x335   : > { %734 = vst [vmem:[%s1401_s29 + $0x30] sm:$0xff] %v702_v51  ;;  %735 = vst [vmem:[%s1401_s29 + $0x38] sm:$0xff] %v703_v14 }
 0x336   : > { %740 = vst [vmem:[%s1401_s29 + $0x60] sm:$0xff] %v708_v15  ;;  %741 = vst [vmem:[%s1401_s29 + $0x68] sm:$0xff] %v709_v0  ;;  %v649_v1 = vpop.permute.xlu1 %648  ;;  %v664_v52 = vpop.permute.xlu0 %663 }
 0x337   : > { %v706_v34 = vmul.f32 %v649_v1, %v1234_v5  ;;  %v707_v26 = vmul.f32 %v649_v1, %v1237_v6  ;;  %v712_v27 = vmul.f32 %v664_v52, %v1274_v20  ;;  %v713_v12 = vmul.f32 %v664_v52, %v1277_v21 }
 0x339   : > { %738 = vst [vmem:[%s1401_s29 + $0x50] sm:$0xff] %v706_v34  ;;  %739 = vst [vmem:[%s1401_s29 + $0x58] sm:$0xff] %v707_v26 }
 0x33a   : > { %744 = vst [vmem:[%s1401_s29 + $0x80] sm:$0xff] %v712_v27  ;;  %745 = vst [vmem:[%s1401_s29 + $0x88] sm:$0xff] %v713_v12  ;;  %v657_v13 = vpop.permute.xlu1 %656  ;;  %v672_v40 = vpop.permute.xlu0 %671 }
 0x33b   : > { %v710_v41 = vmul.f32 %v657_v13, %v1284_v24  ;;  %v711_v5 = vmul.f32 %v657_v13, %v1287_v25  ;;  %v716_v6 = vmul.f32 %v672_v40, %v1306_v32  ;;  %v717_v20 = vmul.f32 %v672_v40, %v1309_v33 }
 0x33d   : > { %742 = vst [vmem:[%s1401_s29 + $0x70] sm:$0xff] %v710_v41  ;;  %743 = vst [vmem:[%s1401_s29 + $0x78] sm:$0xff] %v711_v5 }
 0x33e   : > { %748 = vst [vmem:[%s1401_s29 + $0xa0] sm:$0xff] %v716_v6  ;;  %749 = vst [vmem:[%s1401_s29 + $0xa8] sm:$0xff] %v717_v20  ;;  %v668_v21 = vpop.permute.xlu1 %667  ;;  %v683_v35 = vpop.permute.xlu0 %682 }
 0x33f   : > { %v714_v53 = vmul.f32 %v668_v21, %v1268_v18  ;;  %v715_v24 = vmul.f32 %v668_v21, %v1271_v19  ;;  %v720_v25 = vmul.f32 %v683_v35, %v1300_v30  ;;  %v721_v32 = vmul.f32 %v683_v35, %v1303_v31 }
 0x341   : > { %746 = vst [vmem:[%s1401_s29 + $0x90] sm:$0xff] %v714_v53  ;;  %747 = vst [vmem:[%s1401_s29 + $0x98] sm:$0xff] %v715_v24 }
 0x342   : > { %752 = vst [vmem:[%s1401_s29 + $0xc0] sm:$0xff] %v720_v25  ;;  %753 = vst [vmem:[%s1401_s29 + $0xc8] sm:$0xff] %v721_v32  ;;  %v676_v33 = vpop.permute.xlu1 %675  ;;  %v691_v54 = vpop.permute.xlu0 %690 }
 0x343   : > { %v718_v18 = vmul.f32 %v676_v33, %v1316_v36  ;;  %v719_v55 = vmul.f32 %v676_v33, %v1319_v37  ;;  %v724_v19 = vmul.f32 %v691_v54, %v1338_v44  ;;  %v725_v30 = vmul.f32 %v691_v54, %v1341_v45 }
 0x345   : > { %750 = vst [vmem:[%s1401_s29 + $0xb0] sm:$0xff] %v718_v18  ;;  %751 = vst [vmem:[%s1401_s29 + $0xb8] sm:$0xff] %v719_v55 }
 0x346   : > { %756 = vst [vmem:[%s1401_s29 + $0xe0] sm:$0xff] %v724_v19  ;;  %757 = vst [vmem:[%s1401_s29 + $0xe8] sm:$0xff] %v725_v30  ;;  %v687_v31 = vpop.permute.xlu1 %686 }
 0x347   : > { %v722_v56 = vmul.f32 %v687_v31, %v1322_v38  ;;  %v723_v61 = vmul.f32 %v687_v31, %v1325_v39  ;;  %v1528_v38 = vld [vmem:[#allocation8_spill] sm:$0xff] }
 0x349   : > { %754 = vst [vmem:[%s1401_s29 + $0xd0] sm:$0xff] %v722_v56  ;;  %755 = vst [vmem:[%s1401_s29 + $0xd8] sm:$0xff] %v723_v61 }
 0x34a   : > { %v695_v36 = vpop.permute.xlu1 %694 }
 0x34b   : > { %v726_v37 = vmul.f32 %v695_v36, %v1332_v42  ;;  %v727_v44 = vmul.f32 %v695_v36, %v1528_v38 }
 0x34d   : > { %758 = vst [vmem:[%s1401_s29 + $0xf0] sm:$0xff] %v726_v37  ;;  %759 = vst [vmem:[%s1401_s29 + $0xf8] sm:$0xff] %v727_v44 }
 0x34e   : > { %1009 = shalt.err (!%p1006_p2)
}
 0x34f   : > { %s1010_s11 = scalar_lea.hbm %s1464_s16, 4096  ;;  %s1014_s26 = scalar_lea.hbm %s1519_s5, 8192 }
 0x350   : > { %p1011_p4 = scmp.ne.s32.totalorder %s1464_s16, %s1010_s11  ;;  %p1015_p9 = scmp.lt.u32.totalorder %s1464_s16, %s1519_s5 }
 0x351   : > { %p1016_p1 = scmp.lt.u32.totalorder %s1014_s26, %s1010_s11  ;;  %p1018_p6 = scmp.lt.u32.totalorder %s1010_s11, %s1464_s16 }
 0x352   : > { %p1012_p5 = pnand %p1011_p4, %p1529_p11 }
 0x353   : > { %p1017_p3 = por %p1016_p1, %p1015_p9 }
 0x354   : > { %p1013_p7 = pneg %p1012_p5 }
 0x355   : > { %p1019_p12 = por %p1018_p6, %p1017_p3 }
 0x357   : > { %p1020_p13 = pnand %p1019_p12, %p1013_p7 }
 0x359   : > { %1023 = shalt.err (!%p1020_p13)
}
 0x35a   : > { %s1071_s25 = smov 256   ;;  %s1072_s14 = smov 16  }
 0x35b   : > { %911 = dma.vmem_to_hbm [thread:$0]  (%p1529_p11), %s1466_s12, 4096, %s1464_s16, %s761_s22, %s1071_s25, %s1071_s25, %s1072_s14  }
 0x35c PF: > { %s790_s15 = sand.u32 1, %s1050_s18   ;;  %p1530_p8 = scmp.ne.s32.totalorder %s1525_s6, 0 }
 0x35d   : > { %p1531_p10 = scmp.ge.s32.totalorder %s1062_s21, 2  ;;  %s791_s8 = scalar_lea.sflag [#allocation4], %s790_s15 }
 0x35f   : > { %p918_p0 = pnand %p1531_p10, %p1530_p8 }
 0x361   : > { %1045 = dma.done.wait (!%p918_p0), %s791_s8, 4096  }
 0x362   : > { %1047 = vsyncadd (!%p918_p0), %s791_s8, 4294963200  ;;  %p18_p2 = scmp.ge.s32.totalorder %s1128_s24, 4   ;;  %s1532_s18 = smov %s1054_s19 }
 0x363   : > { %s1533_s19 = smov %s1058_s20  ;;  %s1534_s20 = smov %s1140_s27 }
 0x364   : > { %s1535_s21 = smov %s1128_s24  ;;  %20 = sbr.rel (!%p18_p2) target bundleno = 5 (0x5), region = 85 }
 0x36b   :  { %796 = vsyncpa [#allocation3], 1 }
 0x36c   :  { %798 = vsyncpa [#allocation3 + $0x1], 1 }
 0x36d   :  { %799 = vsyncpa [#allocation4], 1 }
 0x36e   :  { %801 = vsyncpa [#allocation4 + $0x1], 1 }

</bundles_post_ra>
